<compile_context>
chip_gen: v7x
topology: tpu7x:2x2x1
jax: 0.10.0
libtpu: 0.0.40
codegen_flags: <defaults>
</compile_context>

<pallas_src>
import jax
import jax.numpy as jnp
from jax.experimental import pallas as pl
from jax.experimental.pallas import tpu as pltpu


def _make_kernel(layers: int, head_dim: int, b_blk: int):
    """Build a Pallas kernel closed over static layers / head_dim / graphs-per-step."""
    h = head_dim

    def kernel(adj_ref, x_ref, *rest):
        out_ref = rest[-1]                           # (b_blk, N, D)
        wb_refs = rest[:-1]
        w_refs = wb_refs[0::2]                       # W_l (pre-folded for l>=2), compute dtype
        b_refs = wb_refs[1::2]                       # b_l: (1, h) f32

        # Weights/biases are grid-resident; load once per step.
        ws = [w_refs[l][...] for l in range(layers)]
        bs = [b_refs[l][...].astype(jnp.float32) for l in range(layers)]

        def row_softmax(z):                          # softmax over the feature axis (dim=1), f32
            m = jnp.max(z, axis=1, keepdims=True)
            e = jnp.exp(z - m)
            s = jnp.sum(e, axis=1, keepdims=True)
            return e * pl.reciprocal(s, approx=True)   # EUP reciprocal instead of VPU divide

        # Static unroll over graphs in this block: independent matmul chains the LLO
        # scheduler can interleave; every store below is a full-width (N, D) store.
        for bi in range(b_blk):
            adj = adj_ref[bi]                        # (N, N) bf16
            x = x_ref[bi]                            # (N, D) bf16

            # g = adj @ x (dense stand-in for torch.sparse.mm), f32 accumulation on the MXU.
            g = jnp.dot(adj, x, preferred_element_type=jnp.float32)        # (N, D) f32
            g_lo = g.astype(adj.dtype)

            a_prev = None
            layer_outs = []
            for l in range(layers):
                if l == 0:
                    # (adj @ g) @ W0 == adj @ (g @ W0); reassociated since D > head_dim.
                    p = jnp.dot(g_lo, ws[0], preferred_element_type=jnp.float32)
                    z = jnp.dot(adj, p.astype(adj.dtype),
                                preferred_element_type=jnp.float32) + bs[0]
                else:
                    # l >= 2 weights were folded in the wrapper:
                    # [a, a] @ W == a @ (W[:h] + W[h:2h])  -> no lane-axis concat of inputs.
                    ax = jnp.dot(adj, a_prev, preferred_element_type=jnp.float32)   # (N, h)
                    z = jnp.dot(ax.astype(adj.dtype), ws[l],
                                preferred_element_type=jnp.float32) + bs[l]
                a = row_softmax(z)                                                   # (N, h) f32
                a_prev = a.astype(adj.dtype)
                layer_outs.append(a)

            # Assemble the full (N, D) result in registers and store once per graph
            # (single lane-dense store instead of `layers` masked slab writes).
            full = layer_outs[0] if layers == 1 else jnp.concatenate(layer_outs, axis=1)
            out_ref[bi] = jnp.tanh(full + g).astype(out_ref.dtype)

    return kernel


def _vmem_limit_bytes():
    """Generation-aware VMEM limit: ~3/4 of physical, capped at 96 MiB (=> ~48 MiB on v7x)."""
    try:
        cap = int(pltpu.get_tpu_info().vmem_capacity_bytes)
    except Exception:
        cap = 64 * 1024 * 1024       # conservative (v7x-sized) fallback
    return min((cap * 3) // 4, 96 * 1024 * 1024)


def _pick_b_blk(B, N, D, budget_bytes):
    """Graphs per grid step: amortize per-step overhead without blowing the VMEM budget,
    and keep >= 2 grid steps when B >= 2 so v7x's two TensorCores both get work."""
    per_graph = (2 * (2 * N * N + 2 * N * D)      # double-buffered bf16 adj + x blocks
                 + 2 * 4 * N * D                  # double-buffered f32 out block
                 + 4 * N * N + 20 * N * D)        # generous in-kernel f32 temporaries
    max_blk = max(1, budget_bytes // per_graph)
    if B >= 2:
        max_blk = max(1, min(max_blk, B // 2))    # never collapse to grid=(1,) when B >= 2
    b_blk = 1
    for d in range(1, min(B, max_blk) + 1):       # largest divisor of B within the cap
        if B % d == 0:
            b_blk = d
    return b_blk


def multi_graph_conv_layer(adj, x, weights, biases, heads=1, *,
                           compute_dtype=jnp.bfloat16, out_dtype=jnp.float32):
    """Forward pass of MultiGraphConvLayer.

    adj : (N, N) or (B, N, N)  dense adjacency (per graph)
    x   : (N, D) or (B, N, D)  node features
    weights[l] : (in_dim_l, head_dim)   so that y = x @ W + b  (torch W.T layout)
    biases[l]  : (head_dim,)
    `heads` is accepted for API parity only: the reference module shares one weight_list
    across heads and every head starts from the same gcn_inputs, so all heads are identical
    and mean-over-heads reduces to a single head.
    """
    squeeze = False
    if adj.ndim == 2:
        adj, x, squeeze = adj[None], x[None], True
    B, N, D = x.shape
    layers = len(weights)
    head_dim = D // layers
    assert layers * head_dim == D, "mem_dim must be divisible by layers"
    assert 1 <= layers <= 3, "reference module is only shape-consistent for layers <= 3"

    vmem_limit = _vmem_limit_bytes()
    b_blk = _pick_b_blk(B, N, D, vmem_limit // 2)
    grid = (B // b_blk,)

    # Fold the l>=2 "cat([AxW, AxW]) @ W" weights in f32 (full precision), then cast once.
    w_list = []
    for l, w in enumerate(weights):
        wf = jnp.asarray(w, jnp.float32)
        if l >= 2:
            wf = wf[:head_dim, :] + wf[head_dim:2 * head_dim, :]
        w_list.append(wf.astype(compute_dtype))

    args = [adj.astype(compute_dtype), x.astype(compute_dtype)]
    in_specs = [
        pl.BlockSpec((b_blk, N, N), lambda b: (b, 0, 0)),   # b_blk graphs' adjacency per step
        pl.BlockSpec((b_blk, N, D), lambda b: (b, 0, 0)),   # b_blk graphs' features per step
    ]
    for w, bvec in zip(w_list, biases):
        args.append(w)
        in_specs.append(pl.BlockSpec(tuple(w.shape), lambda b: (0, 0)))   # resident across grid
        args.append(jnp.asarray(bvec).reshape(1, -1).astype(jnp.float32))
        in_specs.append(pl.BlockSpec((1, head_dim), lambda b: (0, 0)))

    # Advisory cost estimate so XLA schedules surrounding ops sensibly.
    flops = 2 * B * (N * N * D                                    # adj @ x
                     + N * D * head_dim + N * N * head_dim        # layer 0 (reassociated)
                     + (layers - 1) * (N * N * head_dim + N * head_dim * head_dim))
    transcendentals = B * N * (layers * head_dim + D)             # exp + tanh
    bytes_accessed = sum(int(a.size) * a.dtype.itemsize for a in args) \
        + B * N * D * jnp.dtype(out_dtype).itemsize
    cost = pl.CostEstimate(flops=flops, transcendentals=transcendentals,
                           bytes_accessed=bytes_accessed)

    out = pl.pallas_call(
        _make_kernel(layers, head_dim, b_blk),
        out_shape=jax.ShapeDtypeStruct((B, N, D), out_dtype),
        grid=grid,                                                 # b_blk graphs per grid step
        in_specs=in_specs,
        out_specs=pl.BlockSpec((b_blk, N, D), lambda b: (b, 0, 0)),
        compiler_params=pltpu.CompilerParams(
            dimension_semantics=("parallel",),                     # v7x: shard steps over 2 TCs
            vmem_limit_bytes=vmem_limit,
        ),
        cost_estimate=cost,
    )(*args)
    return out[0] if squeeze else out


def _ref_forward(adj, x, weights, biases, heads, layers):
    """Pure-JAX f32 reference of the PyTorch module (eval mode), single graph."""
    g = adj @ x
    head_list = []
    for _ in range(heads):
        outputs = g
        outs = []
        for l in range(layers):
            axw = (adj @ outputs) @ weights[l] + biases[l]
            axw = jax.nn.softmax(axw, axis=1)
            outputs = axw
            if l >= 1:
                outputs = jnp.concatenate([outputs, axw], axis=1)
            outs.append(axw)
        head_list.append(jnp.concatenate(outs, axis=1) + g)
    return jnp.tanh(jnp.mean(jnp.stack(head_list), axis=0))


if __name__ == "__main__":
    B = 4            # batch of graphs -> grid=(2,) with b_blk=2 (>= 2 parallel steps for v7x)
    N = 16           # nodes per graph
    MEM_DIM = 64     # mem_dim
    LAYERS = 2       # layers
    HEADS = 3        # heads (shared weights -> collapsed inside the kernel)
    HEAD_DIM = MEM_DIM // LAYERS
    # gcn_dropout: identity in eval mode (forward-pass kernel)

    key = jax.random.PRNGKey(0)
    k_adj, k_x, k_rest = jax.random.split(key, 3)

    adj = jax.random.uniform(k_adj, (B, N, N), jnp.float32)
    adj = adj / jnp.sum(adj, axis=-1, keepdims=True)          # row-normalized dense adjacency
    x = jax.random.normal(k_x, (B, N, MEM_DIM), jnp.float32)

    # nn.Linear shapes: weight_list[0]: mem_dim -> head_dim; weight_list[j]: head_dim*j -> head_dim
    in_dims = [MEM_DIM] + [HEAD_DIM * j for j in range(1, LAYERS)]
    weights, biases = [], []
    for din in in_dims:
        kw, kb, k_rest = jax.random.split(k_rest, 3)
        bound = float(din) ** -0.5
        weights.append(jax.random.uniform(kw, (din, HEAD_DIM), jnp.float32, -bound, bound))
        biases.append(jax.random.uniform(kb, (HEAD_DIM,), jnp.float32, -bound, bound))

    out = multi_graph_conv_layer(adj, x, weights, biases, HEADS)
    jax.block_until_ready(out)
    assert out.shape == (B, N, MEM_DIM) and out.dtype == jnp.float32
    assert bool(jnp.all(jnp.isfinite(out)))

    # Loose check vs pure-JAX f32 reference (kernel runs bf16 matmuls + approx reciprocal).
    ref = jnp.stack([_ref_forward(adj[b], x[b], weights, biases, HEADS, LAYERS)
                     for b in range(B)])
    max_err = float(jnp.max(jnp.abs(out - ref)))
    assert max_err < 5e-2, f"mismatch vs reference: {max_err}"

    print("KERNEL_OK")
</pallas_src>

<mosaic_0001>
module attributes {stable_mosaic.version = 11 : i64} {
  func.func @kernel(%arg0: i32, %arg1: memref<2x16x16xbf16, #tpu.memory_space<vmem>>, %arg2: memref<2x16x64xbf16, #tpu.memory_space<vmem>>, %arg3: memref<64x32xbf16, #tpu.memory_space<vmem>>, %arg4: memref<1x32xf32, #tpu.memory_space<vmem>>, %arg5: memref<32x32xbf16, #tpu.memory_space<vmem>>, %arg6: memref<1x32xf32, #tpu.memory_space<vmem>>, %arg7: memref<2x16x64xf32, #tpu.memory_space<vmem>>) attributes {dimension_semantics = [#tpu.dimension_semantics<parallel>], iteration_bounds = array<i64: 2>, scalar_prefetch = 0 : i64, scratch_operands = 0 : i64, tpu.core_type = #tpu.core_type<tc>, window_params = [{transform_indices = @transform_0, window_bounds = array<i64: 2, 16, 16>}, {transform_indices = @transform_1, window_bounds = array<i64: 2, 16, 64>}, {pipeline_mode = #tpu.pipeline_mode<synchronous>, transform_indices = @transform_2, window_bounds = array<i64: 64, 32>}, {pipeline_mode = #tpu.pipeline_mode<synchronous>, transform_indices = @transform_3, window_bounds = array<i64: 1, 32>}, {pipeline_mode = #tpu.pipeline_mode<synchronous>, transform_indices = @transform_4, window_bounds = array<i64: 32, 32>}, {pipeline_mode = #tpu.pipeline_mode<synchronous>, transform_indices = @transform_5, window_bounds = array<i64: 1, 32>}, {transform_indices = @transform_6, window_bounds = array<i64: 2, 16, 64>}]} {
    %c0 = arith.constant 0 : index
    %c0_0 = arith.constant 0 : index
    %0 = vector.load %arg3[%c0, %c0_0] : memref<64x32xbf16, #tpu.memory_space<vmem>>, vector<64x32xbf16>
    %c0_1 = arith.constant 0 : index
    %c0_2 = arith.constant 0 : index
    %1 = vector.load %arg5[%c0_1, %c0_2] : memref<32x32xbf16, #tpu.memory_space<vmem>>, vector<32x32xbf16>
    %c0_3 = arith.constant 0 : index
    %c0_4 = arith.constant 0 : index
    %2 = vector.load %arg4[%c0_3, %c0_4] : memref<1x32xf32, #tpu.memory_space<vmem>>, vector<1x32xf32>
    %c0_5 = arith.constant 0 : index
    %c0_6 = arith.constant 0 : index
    %3 = vector.load %arg6[%c0_5, %c0_6] : memref<1x32xf32, #tpu.memory_space<vmem>>, vector<1x32xf32>
    %c0_7 = arith.constant 0 : index
    %c0_8 = arith.constant 0 : index
    %c0_9 = arith.constant 0 : index
    %4 = vector.load %arg1[%c0_7, %c0_8, %c0_9] : memref<2x16x16xbf16, #tpu.memory_space<vmem>>, vector<1x16x16xbf16>
    %5 = vector.shape_cast %4 : vector<1x16x16xbf16> to vector<16x16xbf16>
    %c0_10 = arith.constant 0 : index
    %c0_11 = arith.constant 0 : index
    %c0_12 = arith.constant 0 : index
    %6 = vector.load %arg2[%c0_10, %c0_11, %c0_12] : memref<2x16x64xbf16, #tpu.memory_space<vmem>>, vector<1x16x64xbf16>
    %7 = vector.shape_cast %6 : vector<1x16x64xbf16> to vector<16x64xbf16>
    %cst = arith.constant dense<0.000000e+00> : vector<16x64xf32>
    %8 = tpu.matmul %5, %7, %cst {dimension_numbers = #tpu.dot_dimension_numbers<[1], [0], [0], [1], [0, 0, 1, 1], [], []>} : vector<16x16xbf16>, vector<16x64xbf16>, vector<16x64xf32> -> vector<16x64xf32>
    %9 = arith.truncf %8 : vector<16x64xf32> to vector<16x64xbf16>
    %cst_13 = arith.constant dense<0.000000e+00> : vector<16x32xf32>
    %10 = tpu.matmul %9, %0, %cst_13 {dimension_numbers = #tpu.dot_dimension_numbers<[1], [0], [0], [1], [0, 0, 1, 1], [], []>} : vector<16x64xbf16>, vector<64x32xbf16>, vector<16x32xf32> -> vector<16x32xf32>
    %11 = arith.truncf %10 : vector<16x32xf32> to vector<16x32xbf16>
    %cst_14 = arith.constant dense<0.000000e+00> : vector<16x32xf32>
    %12 = tpu.matmul %5, %11, %cst_14 {dimension_numbers = #tpu.dot_dimension_numbers<[1], [0], [0], [1], [0, 0, 1, 1], [], []>} : vector<16x16xbf16>, vector<16x32xbf16>, vector<16x32xf32> -> vector<16x32xf32>
    %13 = vector.broadcast %2 : vector<1x32xf32> to vector<16x32xf32>
    %14 = arith.addf %12, %13 : vector<16x32xf32>
    %cst_15 = arith.constant dense<0xFF800000> : vector<16xf32>
    %15 = vector.multi_reduction <maximumf>, %14, %cst_15 [1] : vector<16x32xf32> to vector<16xf32>
    %16 = vector.shape_cast %15 : vector<16xf32> to vector<16x1xf32>
    %17 = vector.broadcast %16 : vector<16x1xf32> to vector<16x32xf32>
    %18 = arith.subf %14, %17 : vector<16x32xf32>
    %19 = math.exp %18 : vector<16x32xf32>
    %cst_16 = arith.constant dense<0.000000e+00> : vector<16xf32>
    %20 = vector.multi_reduction <add>, %19, %cst_16 [1] : vector<16x32xf32> to vector<16xf32>
    %21 = vector.shape_cast %20 : vector<16xf32> to vector<16x1xf32>
    %22 = tpu.reciprocal %21 {approx = true} : vector<16x1xf32> -> vector<16x1xf32>
    %23 = vector.broadcast %22 : vector<16x1xf32> to vector<16x32xf32>
    %24 = arith.mulf %19, %23 : vector<16x32xf32>
    %25 = arith.truncf %24 : vector<16x32xf32> to vector<16x32xbf16>
    %cst_17 = arith.constant dense<0.000000e+00> : vector<16x32xf32>
    %26 = tpu.matmul %5, %25, %cst_17 {dimension_numbers = #tpu.dot_dimension_numbers<[1], [0], [0], [1], [0, 0, 1, 1], [], []>} : vector<16x16xbf16>, vector<16x32xbf16>, vector<16x32xf32> -> vector<16x32xf32>
    %27 = arith.truncf %26 : vector<16x32xf32> to vector<16x32xbf16>
    %cst_18 = arith.constant dense<0.000000e+00> : vector<16x32xf32>
    %28 = tpu.matmul %27, %1, %cst_18 {dimension_numbers = #tpu.dot_dimension_numbers<[1], [0], [0], [1], [0, 0, 1, 1], [], []>} : vector<16x32xbf16>, vector<32x32xbf16>, vector<16x32xf32> -> vector<16x32xf32>
    %29 = vector.broadcast %3 : vector<1x32xf32> to vector<16x32xf32>
    %30 = arith.addf %28, %29 : vector<16x32xf32>
    %cst_19 = arith.constant dense<0xFF800000> : vector<16xf32>
    %31 = vector.multi_reduction <maximumf>, %30, %cst_19 [1] : vector<16x32xf32> to vector<16xf32>
    %32 = vector.shape_cast %31 : vector<16xf32> to vector<16x1xf32>
    %33 = vector.broadcast %32 : vector<16x1xf32> to vector<16x32xf32>
    %34 = arith.subf %30, %33 : vector<16x32xf32>
    %35 = math.exp %34 : vector<16x32xf32>
    %cst_20 = arith.constant dense<0.000000e+00> : vector<16xf32>
    %36 = vector.multi_reduction <add>, %35, %cst_20 [1] : vector<16x32xf32> to vector<16xf32>
    %37 = vector.shape_cast %36 : vector<16xf32> to vector<16x1xf32>
    %38 = tpu.reciprocal %37 {approx = true} : vector<16x1xf32> -> vector<16x1xf32>
    %39 = vector.broadcast %38 : vector<16x1xf32> to vector<16x32xf32>
    %40 = arith.mulf %35, %39 : vector<16x32xf32>
    %41 = tpu.concatenate %24, %40 in 1 : vector<16x32xf32>, vector<16x32xf32> -> vector<16x64xf32>
    %42 = arith.addf %41, %8 : vector<16x64xf32>
    %43 = math.tanh %42 : vector<16x64xf32>
    %c0_21 = arith.constant 0 : index
    %c0_22 = arith.constant 0 : index
    %c0_23 = arith.constant 0 : index
    %44 = vector.load %arg7[%c0_21, %c0_22, %c0_23] : memref<2x16x64xf32, #tpu.memory_space<vmem>>, vector<1x16x64xf32>
    %45 = vector.shape_cast %44 : vector<1x16x64xf32> to vector<16x64xf32>
    %46 = vector.shape_cast %43 : vector<16x64xf32> to vector<1x16x64xf32>
    tpu.vector_store %arg7[%c0_21, %c0_22, %c0_23], %46 {strides = array<i32>} : memref<2x16x64xf32, #tpu.memory_space<vmem>>, vector<1x16x64xf32>,
    %c1 = arith.constant 1 : index
    %c0_24 = arith.constant 0 : index
    %c0_25 = arith.constant 0 : index
    %47 = vector.load %arg1[%c1, %c0_24, %c0_25] : memref<2x16x16xbf16, #tpu.memory_space<vmem>>, vector<1x16x16xbf16>
    %48 = vector.shape_cast %47 : vector<1x16x16xbf16> to vector<16x16xbf16>
    %c1_26 = arith.constant 1 : index
    %c0_27 = arith.constant 0 : index
    %c0_28 = arith.constant 0 : index
    %49 = vector.load %arg2[%c1_26, %c0_27, %c0_28] : memref<2x16x64xbf16, #tpu.memory_space<vmem>>, vector<1x16x64xbf16>
    %50 = vector.shape_cast %49 : vector<1x16x64xbf16> to vector<16x64xbf16>
    %cst_29 = arith.constant dense<0.000000e+00> : vector<16x64xf32>
    %51 = tpu.matmul %48, %50, %cst_29 {dimension_numbers = #tpu.dot_dimension_numbers<[1], [0], [0], [1], [0, 0, 1, 1], [], []>} : vector<16x16xbf16>, vector<16x64xbf16>, vector<16x64xf32> -> vector<16x64xf32>
    %52 = arith.truncf %51 : vector<16x64xf32> to vector<16x64xbf16>
    %cst_30 = arith.constant dense<0.000000e+00> : vector<16x32xf32>
    %53 = tpu.matmul %52, %0, %cst_30 {dimension_numbers = #tpu.dot_dimension_numbers<[1], [0], [0], [1], [0, 0, 1, 1], [], []>} : vector<16x64xbf16>, vector<64x32xbf16>, vector<16x32xf32> -> vector<16x32xf32>
    %54 = arith.truncf %53 : vector<16x32xf32> to vector<16x32xbf16>
    %cst_31 = arith.constant dense<0.000000e+00> : vector<16x32xf32>
    %55 = tpu.matmul %48, %54, %cst_31 {dimension_numbers = #tpu.dot_dimension_numbers<[1], [0], [0], [1], [0, 0, 1, 1], [], []>} : vector<16x16xbf16>, vector<16x32xbf16>, vector<16x32xf32> -> vector<16x32xf32>
    %56 = vector.broadcast %2 : vector<1x32xf32> to vector<16x32xf32>
    %57 = arith.addf %55, %56 : vector<16x32xf32>
    %cst_32 = arith.constant dense<0xFF800000> : vector<16xf32>
    %58 = vector.multi_reduction <maximumf>, %57, %cst_32 [1] : vector<16x32xf32> to vector<16xf32>
    %59 = vector.shape_cast %58 : vector<16xf32> to vector<16x1xf32>
    %60 = vector.broadcast %59 : vector<16x1xf32> to vector<16x32xf32>
    %61 = arith.subf %57, %60 : vector<16x32xf32>
    %62 = math.exp %61 : vector<16x32xf32>
    %cst_33 = arith.constant dense<0.000000e+00> : vector<16xf32>
    %63 = vector.multi_reduction <add>, %62, %cst_33 [1] : vector<16x32xf32> to vector<16xf32>
    %64 = vector.shape_cast %63 : vector<16xf32> to vector<16x1xf32>
    %65 = tpu.reciprocal %64 {approx = true} : vector<16x1xf32> -> vector<16x1xf32>
    %66 = vector.broadcast %65 : vector<16x1xf32> to vector<16x32xf32>
    %67 = arith.mulf %62, %66 : vector<16x32xf32>
    %68 = arith.truncf %67 : vector<16x32xf32> to vector<16x32xbf16>
    %cst_34 = arith.constant dense<0.000000e+00> : vector<16x32xf32>
    %69 = tpu.matmul %48, %68, %cst_34 {dimension_numbers = #tpu.dot_dimension_numbers<[1], [0], [0], [1], [0, 0, 1, 1], [], []>} : vector<16x16xbf16>, vector<16x32xbf16>, vector<16x32xf32> -> vector<16x32xf32>
    %70 = arith.truncf %69 : vector<16x32xf32> to vector<16x32xbf16>
    %cst_35 = arith.constant dense<0.000000e+00> : vector<16x32xf32>
    %71 = tpu.matmul %70, %1, %cst_35 {dimension_numbers = #tpu.dot_dimension_numbers<[1], [0], [0], [1], [0, 0, 1, 1], [], []>} : vector<16x32xbf16>, vector<32x32xbf16>, vector<16x32xf32> -> vector<16x32xf32>
    %72 = vector.broadcast %3 : vector<1x32xf32> to vector<16x32xf32>
    %73 = arith.addf %71, %72 : vector<16x32xf32>
    %cst_36 = arith.constant dense<0xFF800000> : vector<16xf32>
    %74 = vector.multi_reduction <maximumf>, %73, %cst_36 [1] : vector<16x32xf32> to vector<16xf32>
    %75 = vector.shape_cast %74 : vector<16xf32> to vector<16x1xf32>
    %76 = vector.broadcast %75 : vector<16x1xf32> to vector<16x32xf32>
    %77 = arith.subf %73, %76 : vector<16x32xf32>
    %78 = math.exp %77 : vector<16x32xf32>
    %cst_37 = arith.constant dense<0.000000e+00> : vector<16xf32>
    %79 = vector.multi_reduction <add>, %78, %cst_37 [1] : vector<16x32xf32> to vector<16xf32>
    %80 = vector.shape_cast %79 : vector<16xf32> to vector<16x1xf32>
    %81 = tpu.reciprocal %80 {approx = true} : vector<16x1xf32> -> vector<16x1xf32>
    %82 = vector.broadcast %81 : vector<16x1xf32> to vector<16x32xf32>
    %83 = arith.mulf %78, %82 : vector<16x32xf32>
    %84 = tpu.concatenate %67, %83 in 1 : vector<16x32xf32>, vector<16x32xf32> -> vector<16x64xf32>
    %85 = arith.addf %84, %51 : vector<16x64xf32>
    %86 = math.tanh %85 : vector<16x64xf32>
    %c1_38 = arith.constant 1 : index
    %c0_39 = arith.constant 0 : index
    %c0_40 = arith.constant 0 : index
    %87 = vector.load %arg7[%c1_38, %c0_39, %c0_40] : memref<2x16x64xf32, #tpu.memory_space<vmem>>, vector<1x16x64xf32>
    %88 = vector.shape_cast %87 : vector<1x16x64xf32> to vector<16x64xf32>
    %89 = vector.shape_cast %86 : vector<16x64xf32> to vector<1x16x64xf32>
    tpu.vector_store %arg7[%c1_38, %c0_39, %c0_40], %89 {strides = array<i32>} : memref<2x16x64xf32, #tpu.memory_space<vmem>>, vector<1x16x64xf32>,
    return
  }
  func.func @transform_0(%arg0: i32) -> (i32, i32, i32) {
    %c0_i32 = arith.constant 0 : i32
    %c0_i32_0 = arith.constant 0 : i32
    %c0_i32_1 = arith.constant 0 : i32
    return %arg0, %c0_i32, %c0_i32_0 : i32, i32, i32
  }
  func.func @transform_1(%arg0: i32) -> (i32, i32, i32) {
    %c0_i32 = arith.constant 0 : i32
    %c0_i32_0 = arith.constant 0 : i32
    %c0_i32_1 = arith.constant 0 : i32
    return %arg0, %c0_i32, %c0_i32_0 : i32, i32, i32
  }
  func.func @transform_2(%arg0: i32) -> (i32, i32) {
    %c0_i32 = arith.constant 0 : i32
    %c0_i32_0 = arith.constant 0 : i32
    %c0_i32_1 = arith.constant 0 : i32
    return %c0_i32, %c0_i32_0 : i32, i32
  }
  func.func @transform_3(%arg0: i32) -> (i32, i32) {
    %c0_i32 = arith.constant 0 : i32
    %c0_i32_0 = arith.constant 0 : i32
    %c0_i32_1 = arith.constant 0 : i32
    return %c0_i32, %c0_i32_0 : i32, i32
  }
  func.func @transform_4(%arg0: i32) -> (i32, i32) {
    %c0_i32 = arith.constant 0 : i32
    %c0_i32_0 = arith.constant 0 : i32
    %c0_i32_1 = arith.constant 0 : i32
    return %c0_i32, %c0_i32_0 : i32, i32
  }
  func.func @transform_5(%arg0: i32) -> (i32, i32) {
    %c0_i32 = arith.constant 0 : i32
    %c0_i32_0 = arith.constant 0 : i32
    %c0_i32_1 = arith.constant 0 : i32
    return %c0_i32, %c0_i32_0 : i32, i32
  }
  func.func @transform_6(%arg0: i32) -> (i32, i32, i32) {
    %c0_i32 = arith.constant 0 : i32
    %c0_i32_0 = arith.constant 0 : i32
    %c0_i32_1 = arith.constant 0 : i32
    return %arg0, %c0_i32, %c0_i32_0 : i32, i32, i32
  }
}

</mosaic_0001>

<bundles_post_ra>
// kernel: tpu_custom_call.1
= control target key start
LH: loop header
LB: loop body
LE: loop exit
PB: predicated region body
PF: predicated region fallthrough
CT: control target
= control target key end

     0   :  { %11 = vsyncpa [#allocation3], 0  ;;  %s1789_s0 = inlined_call_operand.vmem [shape: bf16[4,16,16], index: 0, kind: input, shape index: {}]   ;;  %s1790_s1 = inlined_call_operand.hbm [shape: bf16[4,16,64], index: 1, kind: input, shape index: {}]   ;;  %s1791_s2 = inlined_call_operand.vmem [shape: bf16[64,32], index: 2, kind: input, shape index: {}]   ;;  %s1792_s3 = inlined_call_operand.vmem [shape: f32[1,32], index: 3, kind: input, shape index: {}]   ;;  %s1793_s4 = inlined_call_operand.vmem [shape: bf16[32,32], index: 4, kind: input, shape index: {}]   ;;  %s1794_s5 = inlined_call_operand.vmem [shape: f32[1,32], index: 5, kind: input, shape index: {}]   ;;  %s1795_s6 = inlined_call_operand.hbm [shape: f32[4,16,64], index: 6, kind: output, shape index: {}]  }
   0x1   :  { %13 = vsyncpa [#allocation3 + $0x1], 0 }
   0x2   :  { %14 = vsyncpa [#allocation4], 0 }
   0x3   :  { %16 = vsyncpa [#allocation4 + $0x1], 0  ;;  %s1454_s21 = smov 0   ;;  %s1456_s22 = smov 0  }
   0x4   :  { %s1458_s23 = smov 0   ;;  %s1460_s24 = smov 0  }
   0x5 LB: > { %s1475_s25 = sadd.s32 4294967295, %s1408_s24   ;;  %s1053_s26 = sadd.s32 4294967294, %s1408_s24   ;;  %s1408_s24 = sphi %s1460_s24, %s1808_s24   ;;  %s1404_s23 = sphi %s1458_s23, %s1807_s23   ;;  %s1400_s22 = sphi %s1456_s22, %s1806_s22   ;;  %s1396_s21 = sphi %s1454_s21, %s1805_s21  }
   0x6   : > { %s1479_s27 = sadd.s32 1, %s1408_s24   ;;  %s55_s28 = sadd.s32 1, %s1404_s23 }
   0x7   : > { %s52_s29 = ssub.s32 %s1408_s24, %s1479_s27  ;;  %p62_p0 = scmp.ne.s32.totalorder %s1404_s23, %s1400_s22 }
   0x8   : > { %p53_p1 = scmp.eq.s32.totalorder %s52_s29, 0  ;;  %p63_p2 = scmp.eq.s32.totalorder %s1408_s24, 0 }
   0x9   : > { %p68_p3 = scmp.ne.s32.totalorder %s1400_s22, %s1396_s21  ;;  %p69_p4 = scmp.eq.s32.totalorder %s1475_s25, 0 }
   0xa   : > { %s1491_s30 = scalar_select %p53_p1, %s1404_s23, %s55_s28  }
   0xb   : > { %p1493_p5 = por %p63_p2, %p62_p0  ;;  %p1497_p6 = por %p69_p4, %p68_p3 }
   0xc   : > { %p176_p7 = scmp.eq.s32.totalorder %s1475_s25, 1  ;;  %p182_p8 = scmp.eq.s32.totalorder %s1053_s26, 1 }
   0xd   : > { %p1221_p10 = scmp.lt.s32.totalorder %s1408_s24, 2  ;;  %s224_s11 = sand.u32 1, %s1404_s23  }
   0xe   : > { %p1504_p11 = por %p176_p7, %p62_p0  ;;  %p1508_p12 = por %p182_p8, %p68_p3 }
   0xf   : > { %s1101_s12 = sshll.u32 %s1408_s24, 8  ;;  %s1056_s13 = sshll.u32 %s224_s11, 4 }
  0x10   : > { %s1799_s9 = scalar_select %p1504_p11, 1, 0 }
  0x11   : > { %s1800_s10 = scalar_select %p1508_p12, 1, 0 }
  0x12   : > { %s1517_s16 = scalar_lea.hbm %s1790_s1, %s1101_s12  ;;  %s228_s17 = scalar_lea.vmem [#allocation2], %s1056_s13 }
  0x13   : > { %s236_s18 = sshll.u32 %s228_s17, 4  ;;  %p1521_p13 = pnand %p1221_p10, %p1493_p5  ;;  %s1525_s18 = int_to_ptr.vmem [resolvable:$true] %s236_s18 }
  0x14   : > { %s1527_s20 = scalar_lea.sflag [#allocation3], %s224_s11  ;;  %s1312_s26 = scalar_lea.hbm %s1517_s16, 256 }
  0x15   : > { %p1313_p0 = scmp.ne.s32.totalorder %s1517_s16, %s1312_s26  ;;  %p1314_p1 = pneg %p1521_p13 }
  0x16   : > { %s1317_s7 = scalar_lea.hbm %s1790_s1, 512  ;;  %p1318_p4 = scmp.lt.u32.totalorder %s1517_s16, %s1790_s1 }
  0x17   : > { %p1315_p2 = pnand %p1314_p1, %p1313_p0  ;;  %p1319_p5 = scmp.lt.u32.totalorder %s1317_s7, %s1312_s26 }
  0x18   : > { %p1321_p8 = scmp.lt.u32.totalorder %s1312_s26, %s1517_s16 }
  0x19   : > { %p1316_p3 = pneg %p1315_p2  ;;  %p1320_p7 = por %p1319_p5, %p1318_p4 }
  0x1b   : > { %p1322_p10 = por %p1321_p8, %p1320_p7 }
  0x1d   : > { %p1323_p9 = pnand %p1322_p10, %p1316_p3 }
  0x1f   : > { %1326 = shalt.err (!%p1323_p9)
}
  0x20   : > { %s1327_s11 = scalar_lea.vmem %s1525_s18, 256  ;;  %s1410_s14 = smov [#allocation2]  }
  0x21   : > { %p1328_p0 = scmp.ne.s32.totalorder %s1525_s18, %s1327_s11  ;;  %s1332_s15 = sshll.u32 %s1410_s14, 4  ;;  %s1333_s15 = int_to_ptr.vmem [resolvable:$false] %s1332_s15 }
  0x22   : > { %s1334_s17 = scalar_lea.vmem %s1333_s15, 512  ;;  %p1335_p11 = scmp.lt.s32.totalorder %s1525_s18, %s1333_s15 }
  0x23   : > { %p1330_p2 = pnand %p1328_p0, %p1314_p1  ;;  %p1336_p4 = scmp.lt.s32.totalorder %s1334_s17, %s1327_s11 }
  0x25   : > { %p1331_p12 = pneg %p1330_p2  ;;  %p1337_p5 = por %p1336_p4, %p1335_p11 }
  0x27   : > { %p1338_p7 = pnand %p1337_p5, %p1331_p12 }
  0x29   : > { %1341 = shalt.err (!%p1338_p7)
}
  0x2a   : > { %s1411_s26 = smov 64   ;;  %s1412_s28 = smov 4  }
  0x2b   : > { %1216 = dma.hbm_to_vmem [thread:$0]  (!%p1521_p13), %s1517_s16, 256, %s1525_s18, %s1527_s20, %s1411_s26, %s1411_s26, %s1412_s28  }
  0x2c   : > { %p1060_p9 = scmp.ge.s32.totalorder %s1408_s24, 1  ;;  %p244_p1 = scmp.lt.s32.totalorder %s1408_s24, 3 }
  0x2e   : > { %p245_p3 = pnand %p1060_p9, %p244_p1 }
  0x2f   : > { %s1558_s29 = sand.u32 (!%p245_p3), 1, %s1400_s22  }
  0x30   : > { %248 = sbr.rel (%p245_p3) target bundleno = 2913 (0xb61), region = 44  ;;  %s1061_s7 = sshll.u32 (!%p245_p3), %s1558_s29, 4 }
  0x31   : > { %s251_s12 = scalar_lea.sflag (!%p245_p3), [#allocation3], %s1558_s29  ;;  %s1562_s13 = scalar_lea.vmem (!%p245_p3), [#allocation2], %s1061_s7 }
  0x37   : > { %1387 = dma.done.wait (%p1497_p6), %s251_s12, 256  }
  0x38   : > { %1389 = vsyncadd (%p1497_p6), %s251_s12, 4294967040  ;;  %s1063_s16 = sshll.u32 %s1475_s25, 1  ;;  %v1413_v0 = vmov 0.0   ;;  %vm1414_vm0 = vmmov 0   ;;  %v1262_v1 = vld [vmem:[%s1562_s13] sm:$0xff]   ;;  %vm328_vm1 = vcmask 130048  }
  0x39   : > { %1133 = vmatprep.subr.bf16.mxu0 %v1413_v0  ;;  %1135 = vmatprep.mubr.msk.bf16.mxu0 %vm1414_vm0, %v1413_v0  ;;  %p290_p11 = scmp.lt.s32.totalorder %s1063_s16, 3  ;;  %v1587_v3 = vld [vmem:[%s1791_s2] sm:$0xff]   ;;  %v1594_v4 = vld [vmem:[%s1791_s2 + $0x8] sm:$0xff]   ;;  %v1605_v5 = vld [vmem:[%s1791_s2 + $0x10] sm:$0xff]   ;;  %vm398_vm2 = vcmask 523264   ;;  %vm491_vm3 = vcmask 261120  }
  0x3a   : > { %1139 = vmatprep.subr.bf16.mxu1 %v1413_v0  ;;  %1147 = vmatprep.mubr.msk.bf16.mxu1 %vm1414_vm0, %v1413_v0  ;;  %v1613_v6 = vld [vmem:[%s1791_s2 + $0x18] sm:$0xff]   ;;  %v1634_v17 = vld [vmem:[%s1792_s3] ss:$0 sm:$0xff]  ;;  %v1271_v46 = vld [vmem:[%s1793_s4 + $0x8] sm:$0xff]   ;;  %s1415_s15 = smov 32   ;;  %s1062_s17 = sshll.u32 %s1558_s29, 5 }
  0x3b   : > { %s1810_s16 = smov (!%p290_p11, %s1063_s16), 3  ;;  %1134 = vmatpush3.bf16.msra.mxu0 %v1262_v1  ;;  %1140 = vmatpush3.bf16.msra.mxu1 %v1587_v3  ;;  %v1270_v36 = vld [vmem:[%s1793_s4] sm:$0xff]   ;;  %v1268_v44 = vld [vmem:[%s1562_s13 + $0x8] sm:$0xff]   ;;  %s288_s26 = scalar_lea.vmem [#allocation5], %s1062_s17 }
  0x3c   : > { %s1102_s18 = sshll.u32 %s1810_s16, 3  ;;  %1151 = vmatprep.subr.bf16.mxu0 %v1413_v0  ;;  %1141 = vmatprep.subr.bf16.mxu1 %v1413_v0  ;;  %s1104_s28 = sshll.u32 %s1475_s25, 9 }
  0x3d   : > { %s1578_s20 = scalar_lea.vmem %s1789_s0, %s1102_s18  ;;  %s968_s7 = sshll.u32 %s288_s26, 4  ;;  %s1744_s7 = int_to_ptr.vmem [resolvable:$true] %s968_s7 }
  0x3e   : > { %v1582_v2 = vld [vmem:[%s1578_s20] sm:$0xff]   ;;  %v1660_v45 = vld [vmem:[%s1578_s20 + $0x8] sm:$0xff]   ;;  %s1742_s18 = scalar_lea.hbm %s1795_s6, %s1104_s28  ;;  %s954_s8 = scalar_lea.sflag [#allocation4], %s1558_s29 }
  0x3f   : > { %1136 = vmatmul.mubr.msk.bf16.vlgmr.msra.gmra.mrb[0].mxu0 %vm328_vm1, %v1582_v2  ;;  %1142 = vmatpush3.bf16.msra.mxu1 %v1594_v4  ;;  %s1342_s19 = scalar_lea.vmem %s1744_s7, 512  ;;  %p1802_p12 = scmp.ne.s32.totalorder %s1799_s9, 0 }
  0x40   : > { %1153 = vmatprep.mubr.msk.bf16.mxu0 %vm1414_vm0, %v1413_v0  ;;  %1143 = vmatprep.subr.bf16.mxu1 %v1413_v0  ;;  %p1343_p6 = scmp.ne.s32.totalorder %s1744_s7, %s1342_s19  ;;  %s1416_s25 = smov [#allocation5]  }
  0x41   : > { %s1346_s13 = sshll.u32 %s1416_s25, 4  ;;  %s1347_s13 = int_to_ptr.vmem [resolvable:$false] %s1346_s13 }
  0x42   : > { %p1344_p13 = pnand %p1343_p6, %p1802_p12  ;;  %s1348_s11 = scalar_lea.vmem %s1347_s13, 1024 }
  0x43   : > { %1144 = vmatpush3.bf16.msra.mxu1 %v1605_v5  ;;  %p1349_p10 = scmp.lt.s32.totalorder %s1744_s7, %s1347_s13  ;;  %p1350_p0 = scmp.lt.s32.totalorder %s1348_s11, %s1342_s19 }
  0x44   : > { %1145 = vmatprep.subr.bf16.mxu1 %v1413_v0  ;;  %p1345_p8 = pneg %p1344_p13 }
  0x45   : > { %p1351_p2 = por %p1350_p0, %p1349_p10 }
  0x47   : > { %1146 = vmatpush3.bf16.msra.mxu1 %v1613_v6  ;;  %p1352_p4 = pnand %p1351_p2, %p1345_p8 }
  0x48   : > { %1163 = vmatprep.subr.bf16.mxu1 %v1413_v0 }
 0x112   : > { %v1617_v7 = vpop.f32.mrb[0].mxu0 }
 0x113   : > { %v1137_v8 = vpop.f32.mrb[1].mxu0 }
 0x114   : > { %v1619_v9 = vpop.f32.mrb[2].mxu0 }
 0x115   : > { %v373_v10 = vpack.c.bf16 %v1619_v9, %v1617_v7  ;;  %v1138_v11 = vpop.f32.mrb[3].mxu0 }
 0x117   : > { %1148 = vmatmul.mubr.msk.bf16.vlgmr.msra.gmra.mrb[0].mxu1 %vm398_vm2, %v373_v10 }
 0x118   : > { %1167 = vmatprep.mubr.msk.bf16.mxu1 %vm1414_vm0, %v1413_v0  ;;  %1164 = vmatpush3.bf16.msra.mxu1 %v1270_v36 }
 0x119   : > { %1165 = vmatprep.subr.bf16.mxu1 %v1413_v0 }
 0x11c   : > { %1166 = vmatpush3.bf16.msra.mxu1 %v1271_v46 }
 0x11d   : > { %1177 = vmatprep.subr.bf16.mxu1 %v1413_v0 }
 0x1ea   : > { %v436_v12 = vpop.f32.mrb[0].mxu1 }
 0x1eb   : > { %v1149_v13 = vpop.f32.mrb[1].mxu1 }
 0x1ec   : > { %v439_v14 = vpop.f32.mrb[2].mxu1 }
 0x1ed   : > { %v443_v15 = vpack.c.bf16 %v439_v14, %v436_v12  ;;  %v1150_v16 = vpop.f32.mrb[3].mxu1 }
 0x1ef   : > { %1152 = vmatpush3.bf16.msra.mxu0 %v443_v15 }
 0x1f0   : > { %1157 = vmatprep.subr.bf16.mxu0 %v1413_v0 }
 0x1f2   : > { %1154 = vmatmul.mubr.msk.bf16.vlgmr.msra.gmra.mrb[4].mxu0 %vm328_vm1, %v1582_v2 }
 0x1f3   : > { %1159 = vmatprep.mubr.msk.bf16.mxu0 %vm1414_vm0, %v1413_v0 }
 0x2c5   : > { %v484_v18 = vpop.f32.mrb[4].mxu0 }
 0x2c6   : > { %v485_v19 = vadd.f32 %v1634_v17, %v484_v18  ;;  %v1155_v20 = vpop.f32.mrb[5].mxu0 }
 0x2c7   : > { %v487_v21 = vpop.f32.mrb[6].mxu0 }
 0x2c8   : > { %v488_v22 = vadd.f32 %v1634_v17, %v487_v21  ;;  %v1156_v23 = vpop.f32.mrb[7].mxu0  ;;  %v492_v24 = vsel %vm491_vm3, %v485_v19, -inf }
 0x2c9   : > { %493 = vmax.xlane.f32.xlu0 %v492_v24 }
 0x2ca   : > { %v495_v25 = vsel %vm491_vm3, %v488_v22, -inf }
 0x2cd   : > { %496 = vmax.xlane.f32.xlu0 %v495_v25 }
 0x356   : > { %v494_v26 = vpop.xlane.xlu0 %493 }
 0x357   : > { %v498_v27 = vsub.f32 %v485_v19, %v494_v26  ;;  %v1077_v19 = vld [vmem:[%s1794_s5] ss:$0 sm:$0xff] }
 0x359   : > { %v500_v28 = vmul.f32 1.442695, %v498_v27 }
 0x35a   : > { %v497_v29 = vpop.xlane.xlu0 %496 }
 0x35b   : > { %1272 = vpow2.f32 %v500_v28  ;;  %v499_v30 = vsub.f32 %v488_v22, %v497_v29 }
 0x35d   : > { %v502_v31 = vmul.f32 1.442695, %v499_v30 }
 0x35f   : > { %1274 = vpow2.f32 %v502_v31 }
 0x365   : > { %v1273_v32 = vpop.eup %1272 }
 0x366   : > { %v504_v33 = vsel %vm491_vm3, %v1273_v32, 0.0 }
 0x367   : > { %505 = vadd.xlane.f32.xlu1 %v504_v33 }
 0x369   : > { %v1275_v34 = vpop.eup %1274 }
 0x36a   : > { %v507_v35 = vsel %vm491_vm3, %v1275_v34, 0.0 }
 0x36b   : > { %508 = vadd.xlane.f32.xlu1 %v507_v35 }
 0x3f4   : > { %v506_v37 = vpop.xlane.xlu1 %505 }
 0x3f5   : > { %1276 = vrcp.f32 %v506_v37 }
 0x3f8   : > { %v509_v38 = vpop.xlane.xlu1 %508 }
 0x3f9   : > { %1278 = vrcp.f32 %v509_v38 }
 0x3ff   : > { %v1277_v39 = vpop.eup %1276 }
 0x400   : > { %v1646_v41 = vmul.f32 %v1277_v39, %v1273_v32 }
 0x403   : > { %v1279_v40 = vpop.eup %1278 }
 0x404   : > { %v1648_v42 = vmul.f32 %v1279_v40, %v1275_v34 }
 0x406   : > { %v514_v43 = vpack.c.bf16 %v1648_v42, %v1646_v41 }
 0x408   : > { %1158 = vmatpush3.bf16.msra.mxu0 %v514_v43 }
 0x409   : > { %1171 = vmatprep.subr.bf16.mxu0 %v1413_v0 }
 0x40b   : > { %1160 = vmatmul.mubr.msk.bf16.vlgmr.msra.gmra.mrb[8].mxu0 %vm328_vm1, %v1582_v2 }
 0x40c   : > { %1172 = vmatpush3.bf16.msra.mxu0 %v1268_v44  ;;  %1173 = vmatprep.mubr.msk.bf16.mxu0 %vm1414_vm0, %v1413_v0 }
 0x40d   : > { %1189 = vmatprep.subr.bf16.mxu0 %v1413_v0 }
 0x413   : > { %1174 = vmatmul.mubr.msk.bf16.vlgmr.msra.gmra.mrb[12].mxu0 %vm328_vm1, %v1660_v45 }
 0x414   : > { %1191 = vmatprep.mubr.msk.bf16.mxu0 %vm1414_vm0, %v1413_v0 }
 0x4de   : > { %v549_v47 = vpop.f32.mrb[8].mxu0 }
 0x4df   : > { %v1161_v48 = vpop.f32.mrb[9].mxu0 }
 0x4e0   : > { %v552_v49 = vpop.f32.mrb[10].mxu0 }
 0x4e1   : > { %v556_v50 = vpack.c.bf16 %v552_v49, %v549_v47  ;;  %v1162_v51 = vpop.f32.mrb[11].mxu0 }
 0x4e3   : > { %1168 = vmatmul.mubr.msk.bf16.vlgmr.msra.gmra.mrb[4].mxu1 %vm491_vm3, %v556_v50 }
 0x4e4   : > { %1178 = vmatpush3.bf16.msra.mxu1 %v1587_v3  ;;  %1185 = vmatprep.mubr.msk.bf16.mxu1 %vm1414_vm0, %v1413_v0 }
 0x4e5   : > { %1179 = vmatprep.subr.bf16.mxu1 %v1413_v0 }
 0x4e6   : > { %v1675_v52 = vpop.f32.mrb[12].mxu0 }
 0x4e7   : > { %v1175_v53 = vpop.f32.mrb[13].mxu0 }
 0x4e8   : > { %1180 = vmatpush3.bf16.msra.mxu1 %v1594_v4  ;;  %v1678_v54 = vpop.f32.mrb[14].mxu0 }
 0x4e9   : > { %1181 = vmatprep.subr.bf16.mxu1 %v1413_v0  ;;  %v718_v55 = vpack.c.bf16 %v1678_v54, %v1675_v52  ;;  %v1176_v56 = vpop.f32.mrb[15].mxu0 }
 0x4ec   : > { %1182 = vmatpush3.bf16.msra.mxu1 %v1605_v5 }
 0x4ed   : > { %1183 = vmatprep.subr.bf16.mxu1 %v1413_v0 }
 0x4f0   : > { %1184 = vmatpush3.bf16.msra.mxu1 %v1613_v6 }
 0x4f1   : > { %1201 = vmatprep.subr.bf16.mxu1 %v1413_v0 }
 0x4f3   : > { %1186 = vmatmul.mubr.msk.bf16.vlgmr.msra.gmra.mrb[8].mxu1 %vm398_vm2, %v718_v55 }
 0x4f4   : > { %1202 = vmatpush3.bf16.msra.mxu1 %v1270_v36  ;;  %1205 = vmatprep.mubr.msk.bf16.mxu1 %vm1414_vm0, %v1413_v0 }
 0x4f5   : > { %1203 = vmatprep.subr.bf16.mxu1 %v1413_v0 }
 0x4f8   : > { %1204 = vmatpush3.bf16.msra.mxu1 %v1271_v46 }
 0x5b6   : > { %v612_v57 = vpop.f32.mrb[4].mxu1 }
 0x5b7   : > { %v1169_v58 = vpop.f32.mrb[5].mxu1  ;;  %v613_v20 = vadd.f32 %v1077_v19, %v612_v57 }
 0x5b8   : > { %v615_v59 = vpop.f32.mrb[6].mxu1 }
 0x5b9   : > { %v1170_v60 = vpop.f32.mrb[7].mxu1  ;;  %v616_v23 = vadd.f32 %v1077_v19, %v615_v59  ;;  %v619_v25 = vsel %vm491_vm3, %v613_v20, -inf }
 0x5bb   : > { %v622_v26 = vsel %vm491_vm3, %v616_v23, -inf }
 0x5c6   : > { %v756_v61 = vpop.f32.mrb[8].mxu1 }
 0x5c7   : > { %v1187_v62 = vpop.f32.mrb[9].mxu1 }
 0x5c8   : > { %v759_v63 = vpop.f32.mrb[10].mxu1 }
 0x5c9   : > { %v763_v1 = vpack.c.bf16 %v759_v63, %v756_v61  ;;  %v1188_v2 = vpop.f32.mrb[11].mxu1 }
 0x5cb   : > { %1190 = vmatpush3.bf16.msra.mxu0 %v763_v1 }
 0x5cc   : > { %1195 = vmatprep.subr.bf16.mxu0 %v1413_v0 }
 0x5ce   : > { %1192 = vmatmul.mubr.msk.bf16.vlgmr.msra.gmra.mrb[16].mxu0 %vm328_vm1, %v1660_v45 }
 0x5cf   : > { %1197 = vmatprep.mubr.msk.bf16.mxu0 %vm1414_vm0, %v1413_v0 }
 0x6a1   : > { %v798_v3 = vpop.f32.mrb[16].mxu0 }
 0x6a2   : > { %v799_v4 = vadd.f32 %v1634_v17, %v798_v3  ;;  %v1193_v5 = vpop.f32.mrb[17].mxu0 }
 0x6a3   : > { %v801_v6 = vpop.f32.mrb[18].mxu0 }
 0x6a4   : > { %v802_v8 = vadd.f32 %v1634_v17, %v801_v6  ;;  %v1194_v10 = vpop.f32.mrb[19].mxu0  ;;  %v805_v11 = vsel %vm491_vm3, %v799_v4, -inf }
 0x6a5   : > { %806 = vmax.xlane.f32.xlu0 %v805_v11 }
 0x6a6   : > { %v808_v12 = vsel %vm491_vm3, %v802_v8, -inf }
 0x6a7   : > { %809 = vmax.xlane.f32.xlu1 %v808_v12 }
 0x732   : > { %v807_v13 = vpop.xlane.xlu0 %806 }
 0x733   : > { %v811_v14 = vsub.f32 %v799_v4, %v807_v13 }
 0x734   : > { %v810_v15 = vpop.xlane.xlu1 %809 }
 0x735   : > { %v813_v16 = vmul.f32 1.442695, %v811_v14  ;;  %v812_v18 = vsub.f32 %v802_v8, %v810_v15 }
 0x737   : > { %1280 = vpow2.f32 %v813_v16  ;;  %v815_v0 = vmul.f32 1.442695, %v812_v18 }
 0x739   : > { %1282 = vpow2.f32 %v815_v0 }
 0x741   : > { %v1281_v17 = vpop.eup %1280 }
 0x742   : > { %v817_v21 = vsel %vm491_vm3, %v1281_v17, 0.0 }
 0x743   : > { %v1283_v22 = vpop.eup %1282  ;;  %818 = vadd.xlane.f32.xlu0 %v817_v21 }
 0x744   : > { %v820_v24 = vsel %vm491_vm3, %v1283_v22, 0.0 }
 0x745   : > { %821 = vadd.xlane.f32.xlu1 %v820_v24 }
 0x747   : > { %620 = vmax.xlane.f32.xlu0 %v619_v25 }
 0x749   : > { %623 = vmax.xlane.f32.xlu1 %v622_v26 }
 0x7d0   : > { %v819_v27 = vpop.xlane.xlu0 %818 }
 0x7d1   : > { %1284 = vrcp.f32 %v819_v27 }
 0x7d2   : > { %v822_v28 = vpop.xlane.xlu1 %821 }
 0x7d3   : > { %1286 = vrcp.f32 %v822_v28 }
 0x7d4   : > { %v621_v39 = vpop.xlane.xlu0 %620 }
 0x7d5   : > { %v625_v43 = vsub.f32 %v613_v20, %v621_v39 }
 0x7d6   : > { %v624_v40 = vpop.xlane.xlu1 %623 }
 0x7d7   : > { %v626_v44 = vsub.f32 %v616_v23, %v624_v40  ;;  %v627_v46 = vmul.f32 1.442695, %v625_v43 }
 0x7d9   : > { %v629_v47 = vmul.f32 1.442695, %v626_v44  ;;  %1288 = vpow2.f32 %v627_v46 }
 0x7db   : > { %v1285_v29 = vpop.eup %1284  ;;  %1290 = vpow2.f32 %v629_v47 }
 0x7dc   : > { %v1707_v31 = vmul.f32 %v1285_v29, %v1281_v17 }
 0x7dd   : > { %v1287_v30 = vpop.eup %1286 }
 0x7de   : > { %v1709_v32 = vmul.f32 %v1287_v30, %v1283_v22 }
 0x7e0   : > { %v827_v33 = vpack.c.bf16 %v1709_v32, %v1707_v31 }
 0x7e2   : > { %1196 = vmatpush3.bf16.msra.mxu0 %v827_v33 }
 0x7e3   : > { %v1289_v56 = vpop.eup %1288 }
 0x7e4   : > { %v631_v59 = vsel %vm491_vm3, %v1289_v56, 0.0 }
 0x7e5   : > { %1198 = vmatmul.mubr.msk.bf16.vlgmr.msra.gmra.mrb[20].mxu0 %vm328_vm1, %v1660_v45  ;;  %v1291_v58 = vpop.eup %1290 }
 0x7e6   : > { %v634_v60 = vsel %vm491_vm3, %v1291_v58, 0.0 }
 0x8b8   : > { %v862_v34 = vpop.f32.mrb[20].mxu0 }
 0x8b9   : > { %v1199_v35 = vpop.f32.mrb[21].mxu0 }
 0x8ba   : > { %v865_v36 = vpop.f32.mrb[22].mxu0 }
 0x8bb   : > { %v869_v37 = vpack.c.bf16 %v865_v36, %v862_v34  ;;  %v1200_v38 = vpop.f32.mrb[23].mxu0 }
 0x8bd   : > { %1206 = vmatmul.mubr.msk.bf16.vlgmr.msra.gmra.mrb[12].mxu1 %vm491_vm3, %v869_v37 }
 0x990   : > { %v907_v48 = vpop.f32.mrb[12].mxu1 }
 0x991   : > { %v908_v49 = vadd.f32 %v1077_v19, %v907_v48  ;;  %v1207_v50 = vpop.f32.mrb[13].mxu1 }
 0x992   : > { %v910_v51 = vpop.f32.mrb[14].mxu1 }
 0x993   : > { %v911_v45 = vadd.f32 %v1077_v19, %v910_v51  ;;  %v1208_v53 = vpop.f32.mrb[15].mxu1  ;;  %v914_v55 = vsel %vm491_vm3, %v908_v49, -inf }
 0x994   : > { %915 = vmax.xlane.f32.xlu0 %v914_v55 }
 0x995   : > { %v917_v57 = vsel %vm491_vm3, %v911_v45, -inf }
 0x996   : > { %918 = vmax.xlane.f32.xlu1 %v917_v57 }
 0x998   : > { %632 = vadd.xlane.f32.xlu0 %v631_v59 }
 0x99a   : > { %635 = vadd.xlane.f32.xlu1 %v634_v60 }
 0xa21   : > { %v916_v61 = vpop.xlane.xlu0 %915 }
 0xa22   : > { %v920_v62 = vsub.f32 %v908_v49, %v916_v61 }
 0xa23   : > { %v919_v63 = vpop.xlane.xlu1 %918 }
 0xa24   : > { %v922_v1 = vmul.f32 1.442695, %v920_v62  ;;  %v921_v2 = vsub.f32 %v911_v45, %v919_v63 }
 0xa25   : > { %v633_v11 = vpop.xlane.xlu0 %632 }
 0xa26   : > { %1292 = vpow2.f32 %v922_v1  ;;  %v924_v3 = vmul.f32 1.442695, %v921_v2 }
 0xa27   : > { %v636_v8 = vpop.xlane.xlu1 %635 }
 0xa28   : > { %1294 = vpow2.f32 %v924_v3 }
 0xa29   : > { %1296 = vrcp.f32 %v636_v8 }
 0xa2a   : > { %1298 = vrcp.f32 %v633_v11 }
 0xa30   : > { %v1293_v4 = vpop.eup %1292 }
 0xa31   : > { %v926_v5 = vsel %vm491_vm3, %v1293_v4, 0.0 }
 0xa32   : > { %v1295_v6 = vpop.eup %1294  ;;  %927 = vadd.xlane.f32.xlu0 %v926_v5 }
 0xa33   : > { %v929_v10 = vsel %vm491_vm3, %v1295_v6, 0.0  ;;  %v1297_v12 = vpop.eup %1296 }
 0xa34   : > { %930 = vadd.xlane.f32.xlu1 %v929_v10  ;;  %v1299_v13 = vpop.eup %1298  ;;  %v640_v14 = vmul.f32 %v1297_v12, %v1291_v58 }
 0xa35   : > { %v639_v15 = vmul.f32 %v1299_v13, %v1289_v56 }
 0xa45   : > { %645 = vrot.lane.b32.xlu1 %v640_v14, %s1415_s15 }
 0xa48   : > { %643 = vrot.lane.b32.xlu0 %v639_v15, %s1415_s15 }
 0xabf   : > { %v928_v16 = vpop.xlane.xlu0 %927 }
 0xac0   : > { %1300 = vrcp.f32 %v928_v16 }
 0xac1   : > { %v931_v18 = vpop.xlane.xlu1 %930 }
 0xac2   : > { %1302 = vrcp.f32 %v931_v18 }
 0xac3   : > { %v644_v0 = vpop.permute.xlu0 %643 }
 0xac4   : > { %v649_v19 = vsel %vm491_vm3, %v1646_v41, %v644_v0 }
 0xac5   : > { %v651_v17 = vadd.f32 %v649_v19, %v1617_v7  ;;  %v646_v20 = vpop.permute.xlu1 %645 }
 0xac6   : > { %v650_v21 = vsel %vm491_vm3, %v1648_v42, %v646_v20 }
 0xac7   : > { %1304 = vtanh.f32 %v651_v17  ;;  %v652_v22 = vadd.f32 %v650_v21, %v1619_v9 }
 0xac9   : > { %1306 = vtanh.f32 %v652_v22 }
 0xaca   : > { %v1301_v23 = vpop.eup %1300 }
 0xacb   : > { %v934_v24 = vmul.f32 %v1301_v23, %v1293_v4 }
 0xacc   : > { %v1303_v25 = vpop.eup %1302 }
 0xacd   : > { %938 = vrot.lane.b32.xlu1 %v934_v24, %s1415_s15  ;;  %v935_v26 = vmul.f32 %v1303_v25, %v1295_v6 }
 0xad1   : > { %v1305_v27 = vpop.eup %1304  ;;  %940 = vrot.lane.b32.xlu1 %v935_v26, %s1415_s15 }
 0xad2   : > { %655 = vst.msk [vmem:[%s288_s26] sm:$0xff] %vm398_vm2, %v1305_v27 }
 0xad3   : > { %v1307_v7 = vpop.eup %1306 }
 0xad4   : > { %656 = vst.msk [vmem:[%s288_s26 + $0x8] sm:$0xff] %vm398_vm2, %v1307_v7 }
 0xb3f   : > { %v939_v41 = vpop.permute.xlu1 %938 }
 0xb40   : > { %v944_v9 = vsel %vm491_vm3, %v1707_v31, %v939_v41 }
 0xb41   : > { %v946_v42 = vadd.f32 %v944_v9, %v1675_v52 }
 0xb43   : > { %1308 = vtanh.f32 %v946_v42  ;;  %v941_v28 = vpop.permute.xlu1 %940 }
 0xb44   : > { %v945_v29 = vsel %vm491_vm3, %v1709_v32, %v941_v28 }
 0xb45   : > { %v947_v30 = vadd.f32 %v945_v29, %v1678_v54 }
 0xb47   : > { %1310 = vtanh.f32 %v947_v30 }
 0xb4d   : > { %v1309_v33 = vpop.eup %1308 }
 0xb4e   : > { %1092 = vst.msk [vmem:[%s288_s26 + $0x10] sm:$0xff] %vm398_vm2, %v1309_v33 }
 0xb51   : > { %v1311_v52 = vpop.eup %1310 }
 0xb52   : > { %1093 = vst.msk [vmem:[%s288_s26 + $0x18] sm:$0xff] %vm398_vm2, %v1311_v52 }
 0xb53   : > { %1355 = shalt.err (!%p1352_p4)
}
 0xb54   : > { %s1356_s20 = scalar_lea.hbm %s1742_s18, 512  ;;  %s1360_s17 = scalar_lea.hbm %s1795_s6, 1024 }
 0xb55   : > { %p1357_p5 = scmp.ne.s32.totalorder %s1742_s18, %s1356_s20  ;;  %p1361_p1 = scmp.lt.u32.totalorder %s1742_s18, %s1795_s6 }
 0xb56   : > { %p1362_p3 = scmp.lt.u32.totalorder %s1360_s17, %s1356_s20  ;;  %p1364_p6 = scmp.lt.u32.totalorder %s1356_s20, %s1742_s18 }
 0xb57   : > { %p1358_p7 = pnand %p1357_p5, %p1802_p12 }
 0xb58   : > { %p1363_p11 = por %p1362_p3, %p1361_p1 }
 0xb59   : > { %p1359_p9 = pneg %p1358_p7 }
 0xb5a   : > { %p1365_p13 = por %p1364_p6, %p1363_p11 }
 0xb5c   : > { %p1366_p8 = pnand %p1365_p13, %p1359_p9 }
 0xb5e   : > { %1369 = shalt.err (!%p1366_p8)
}
 0xb5f   : > { %s1417_s12 = smov 128   ;;  %s1418_s16 = smov 8  }
 0xb60   : > { %1211 = dma.vmem_to_hbm [thread:$0]  (%p1802_p12), %s1744_s7, 512, %s1742_s18, %s954_s8, %s1417_s12, %s1417_s12, %s1418_s16  }
 0xb61 PF: > { %s983_s19 = sand.u32 1, %s1396_s21   ;;  %p1803_p10 = scmp.ne.s32.totalorder %s1800_s10, 0 }
 0xb62   : > { %p1804_p0 = scmp.ge.s32.totalorder %s1408_s24, 2  ;;  %s984_s25 = scalar_lea.sflag [#allocation4], %s983_s19 }
 0xb64   : > { %p1218_p2 = pnand %p1804_p0, %p1803_p10 }
 0xb66   : > { %1391 = dma.done.wait (!%p1218_p2), %s984_s25, 512  }
 0xb67   : > { %1393 = vsyncadd (!%p1218_p2), %s984_s25, 4294966784  ;;  %p19_p4 = scmp.ge.s32.totalorder %s1479_s27, 4   ;;  %s1805_s21 = smov %s1400_s22 }
 0xb68   : > { %s1806_s22 = smov %s1404_s23  ;;  %s1807_s23 = smov %s1491_s30 }
 0xb69   : > { %s1808_s24 = smov %s1479_s27  ;;  %21 = sbr.rel (!%p19_p4) target bundleno = 5 (0x5), region = 95 }
 0xb70   :  { %989 = vsyncpa [#allocation3], 1 }
 0xb71   :  { %991 = vsyncpa [#allocation3 + $0x1], 1 }
 0xb72   :  { %992 = vsyncpa [#allocation4], 1 }
 0xb73   :  { %994 = vsyncpa [#allocation4 + $0x1], 1 }

</bundles_post_ra>
